<compile_context>
chip_gen: v6e
topology: v6e:2x2x1
jax: 0.10.0
libtpu: 0.0.40
codegen_flags: <defaults>
</compile_context>

<pallas_src>
import functools
import math

import jax
import jax.numpy as jnp
from jax import lax
from jax.experimental import pallas as pl
from jax.experimental.pallas import tpu as pltpu


# ---------------------------------------------------------------------------
# Tile helpers.
# ---------------------------------------------------------------------------
def _pick_tile(dim, cap, align):
    """Largest tile <= cap that divides `dim` and is a multiple of `align`.

    Falls back to the full dimension (always layout-legal) but fails loudly
    when that would create an oversized block.
    """
    if dim <= cap:
        return dim
    t = (cap // align) * align
    while t >= align:
        if dim % t == 0:
            return t
        t -= align
    if dim > 8 * cap:
        raise ValueError(
            f"_pick_tile: no {align}-aligned divisor of {dim} <= {cap}; "
            "pad the dimension to a tile-friendly size instead of using a "
            "single oversized block.")
    return dim


def _pick_group_width(d_model, d_k):
    """Width of one head-group (lanes processed per flash grid step).

    Smallest multiple of 128 that contains whole heads and divides d_model;
    falls back to d_model (full minor dim is always layout-legal).
    """
    if d_model <= 128:
        return d_model
    gw = 128
    while gw <= d_model:
        if gw % d_k == 0 and d_model % gw == 0:
            return gw
        gw += 128
    return d_model


# ---------------------------------------------------------------------------
# Tiled linear layer:  y = x @ W^T + b
#   W kept in native (N, K) = (out_features, in_features) layout (no w.T copy)
#   x streamed in its own dtype and cast to the weight dtype on the VMEM tile.
# ---------------------------------------------------------------------------
def _linear_kernel(x_ref, w_ref, b_ref, o_ref, acc_ref):
    kk = pl.program_id(2)

    @pl.when(kk == 0)
    def _():
        acc_ref[...] = jnp.zeros_like(acc_ref)

    x = x_ref[...].astype(w_ref.dtype)          # cast tile in VMEM (no HBM trip)
    acc_ref[...] += lax.dot_general(
        x, w_ref[...], (((1,), (1,)), ((), ())),  # contract x.K with W.K
        preferred_element_type=jnp.float32)

    @pl.when(kk == pl.num_programs(2) - 1)
    def _():
        o_ref[...] = (acc_ref[...] + b_ref[...]).astype(o_ref.dtype)


def linear_pallas(x, w, b, out_dtype, tm_cap=512, tn_cap=512, tk_cap=1024):
    M, K = x.shape
    N, K2 = w.shape
    assert K == K2 and b.shape == (1, N)
    tm = _pick_tile(M, tm_cap, 8)
    tn = _pick_tile(N, tn_cap, 128)
    tk = _pick_tile(K, tk_cap, 128)
    grid = (M // tm, N // tn, K // tk)

    return pl.pallas_call(
        _linear_kernel,
        out_shape=jax.ShapeDtypeStruct((M, N), out_dtype),
        grid_spec=pltpu.PrefetchScalarGridSpec(
            num_scalar_prefetch=0,
            grid=grid,
            in_specs=[
                pl.BlockSpec((tm, tk), lambda i, j, k: (i, k)),   # x
                pl.BlockSpec((tn, tk), lambda i, j, k: (j, k)),   # W (N, K)
                pl.BlockSpec((1, tn), lambda i, j, k: (0, j)),    # bias
            ],
            out_specs=pl.BlockSpec((tm, tn), lambda i, j, k: (i, j)),
            scratch_shapes=[pltpu.VMEM((tm, tn), jnp.float32)],
        ),
        compiler_params=pltpu.CompilerParams(
            dimension_semantics=("parallel", "parallel", "arbitrary")),
    )(x, w, b)


# ---------------------------------------------------------------------------
# Flash-attention core directly in (B, S, D) layout.
#   grid = (B, head_groups, q_tiles, kv_tiles); each step handles `n_heads`
#   heads (group width gw = n_heads * d_k lanes).  Scale pre-folded into Q.
# ---------------------------------------------------------------------------
def _flash_kernel(q_ref, k_ref, v_ref, o_ref, m_sc, l_sc, acc_sc, *,
                  n_heads, d_k):
    ki = pl.program_id(3)

    @pl.when(ki == 0)
    def _():
        m_sc[...] = jnp.full(m_sc.shape, -jnp.inf, m_sc.dtype)
        l_sc[...] = jnp.zeros_like(l_sc)
        acc_sc[...] = jnp.zeros_like(acc_sc)

    q = q_ref[0]          # (tq, gw) bf16, 1/sqrt(d_k) already folded into Q
    k = k_ref[0]          # (tk, gw)
    v = v_ref[0]          # (tk, gw)

    for hh in range(n_heads):
        lo = hh * d_k
        qh = q[:, lo:lo + d_k]
        kh = k[:, lo:lo + d_k]
        vh = v[:, lo:lo + d_k]

        # scores tile (tq, tk), f32 accumulation on the MXU
        s = lax.dot_general(qh, kh, (((1,), (1,)), ((), ())),
                            preferred_element_type=jnp.float32)

        m_prev = m_sc[:, hh:hh + 1]
        m_new = jnp.maximum(m_prev, jnp.max(s, axis=-1, keepdims=True))
        alpha = jnp.exp(m_prev - m_new)
        p = jnp.exp(s - m_new)                     # one exp per score element
        l_sc[:, hh:hh + 1] = (alpha * l_sc[:, hh:hh + 1]
                              + jnp.sum(p, axis=-1, keepdims=True))
        acc_sc[:, lo:lo + d_k] = (
            alpha * acc_sc[:, lo:lo + d_k]
            + jnp.dot(p.astype(vh.dtype), vh,
                      preferred_element_type=jnp.float32))
        m_sc[:, hh:hh + 1] = m_new

    @pl.when(ki == pl.num_programs(3) - 1)
    def _():
        inv = pl.reciprocal(l_sc[...], approx=True)     # (tq, n_heads)
        for hh in range(n_heads):
            lo = hh * d_k
            acc_sc[:, lo:lo + d_k] = acc_sc[:, lo:lo + d_k] * inv[:, hh:hh + 1]
        # single lane-dense (tq, gw) store into the (B, S, D) output
        o_ref[0] = acc_sc[...].astype(o_ref.dtype)


def flash_attention_pallas(q, k, v, d_model, num_heads,
                           col_offsets=(0, 0, 0), tq=None, tk=None):
    """q/k/v: (B, S, W) with W == d_model, or the same fused (B, S, 3*d_model)
    array for all three (column offsets select the Q/K/V slabs)."""
    B, S, _ = q.shape
    d_k = d_model // num_heads
    gw = _pick_group_width(d_model, d_k)
    heads_per_group = gw // d_k
    n_groups = d_model // gw

    if tq is None:
        tq = _pick_tile(S, 512, 128)     # grow tq in preference to tk
    if tk is None:
        tk = _pick_tile(S, 256, 128)
    assert S % tq == 0 and S % tk == 0
    for off in col_offsets:
        assert off % gw == 0
    oq, ok, ov = (off // gw for off in col_offsets)

    grid = (B, n_groups, S // tq, S // tk)

    q_spec = pl.BlockSpec((1, tq, gw), lambda b, g, qi, ki: (b, qi, oq + g))
    k_spec = pl.BlockSpec((1, tk, gw), lambda b, g, qi, ki: (b, ki, ok + g))
    v_spec = pl.BlockSpec((1, tk, gw), lambda b, g, qi, ki: (b, ki, ov + g))
    o_spec = pl.BlockSpec((1, tq, gw), lambda b, g, qi, ki: (b, qi, g))

    kernel = functools.partial(_flash_kernel, n_heads=heads_per_group, d_k=d_k)

    return pl.pallas_call(
        kernel,
        out_shape=jax.ShapeDtypeStruct((B, S, d_model), q.dtype),
        grid_spec=pltpu.PrefetchScalarGridSpec(
            num_scalar_prefetch=0,
            grid=grid,
            in_specs=[q_spec, k_spec, v_spec],
            out_specs=o_spec,
            scratch_shapes=[
                pltpu.VMEM((tq, heads_per_group), jnp.float32),   # running max
                pltpu.VMEM((tq, heads_per_group), jnp.float32),   # running sum
                pltpu.VMEM((tq, gw), jnp.float32),                # output acc
            ],
        ),
        compiler_params=pltpu.CompilerParams(
            dimension_semantics=("parallel", "parallel", "parallel",
                                 "arbitrary")),
    )(q, k, v)


# ---------------------------------------------------------------------------
# Full MultiHeadedAttention forward.
# ---------------------------------------------------------------------------
def multi_headed_attention(query, key, value, params, h,
                           compute_dtype=jnp.bfloat16, tq=None, tk=None):
    # TODO(synk): attention-mask path (mask != None) and train-mode dropout
    # are not implemented (eval-mode forward; dropout = identity).
    B, S, D = query.shape
    assert D % h == 0
    d_k = D // h
    scale = 1.0 / math.sqrt(d_k)
    f32 = jnp.float32
    cdt = compute_dtype

    # Fold the 1/sqrt(d_k) softmax scale into the Q projection (free).
    wq = (params["wq"] * scale).astype(cdt)          # (D, D)  (out, in) layout
    wk = params["wk"].astype(cdt)
    wv = params["wv"].astype(cdt)
    bq = (params["bq"] * scale).astype(f32).reshape(1, D)
    bk = params["bk"].astype(f32).reshape(1, D)
    bv = params["bv"].astype(f32).reshape(1, D)

    gw = _pick_group_width(D, d_k)
    self_attn = (query is key) and (key is value)
    fuse_qkv = self_attn and (gw % 128 == 0)         # lane-legal column groups

    x2d = query.reshape(B * S, D)                    # free reshape
    if fuse_qkv:
        # One matmul reads x once and produces Q|K|V side by side; the flash
        # kernel addresses the three slabs via column offsets (no slicing copy).
        w_qkv = jnp.concatenate([wq, wk, wv], axis=0)      # (3D, D)
        b_qkv = jnp.concatenate([bq, bk, bv], axis=1)      # (1, 3D)
        qkv = linear_pallas(x2d, w_qkv, b_qkv, out_dtype=cdt)
        qkv = qkv.reshape(B, S, 3 * D)                     # free reshape
        qp = kp = vp = qkv
        col_offsets = (0, D, 2 * D)
    else:
        qp = linear_pallas(x2d, wq, bq, out_dtype=cdt).reshape(B, S, D)
        kp = linear_pallas(key.reshape(B * S, D), wk, bk,
                           out_dtype=cdt).reshape(B, S, D)
        vp = linear_pallas(value.reshape(B * S, D), wv, bv,
                           out_dtype=cdt).reshape(B, S, D)
        col_offsets = (0, 0, 0)

    ctx = flash_attention_pallas(qp, kp, vp, d_model=D, num_heads=h,
                                 col_offsets=col_offsets, tq=tq, tk=tk)

    out = linear_pallas(ctx.reshape(B * S, D),
                        params["wo"].astype(cdt),
                        params["bo"].astype(f32).reshape(1, D),
                        out_dtype=query.dtype)
    return out.reshape(B, S, D)


# ---------------------------------------------------------------------------
# Pure-JAX f32 reference mirroring the PyTorch forward (dropout = identity).
# ---------------------------------------------------------------------------
def _reference_mha(query, key, value, params, h):
    B, S, D = query.shape
    d_k = D // h

    def lin(x, w, b):
        return x @ w.T + b

    q = lin(query, params["wq"], params["bq"]).reshape(B, S, h, d_k).transpose(0, 2, 1, 3)
    k = lin(key,   params["wk"], params["bk"]).reshape(B, S, h, d_k).transpose(0, 2, 1, 3)
    v = lin(value, params["wv"], params["bv"]).reshape(B, S, h, d_k).transpose(0, 2, 1, 3)

    scores = jnp.einsum("bhqd,bhkd->bhqk", q, k) / math.sqrt(d_k)
    p = jax.nn.softmax(scores, axis=-1)
    x = jnp.einsum("bhqk,bhkd->bhqd", p, v)
    x = x.transpose(0, 2, 1, 3).reshape(B, S, D)
    return lin(x, params["wo"], params["bo"])


if __name__ == "__main__":
    base_key = jax.random.PRNGKey(0)

    def run_case(case_idx, B, S, D, H, tq=None, tk=None, self_attn=False):
        ks = jax.random.split(jax.random.fold_in(base_key, case_idx), 12)
        bound = 1.0 / math.sqrt(D)

        def u(kk, shape):
            return jax.random.uniform(kk, shape, jnp.float32, -bound, bound)

        params = {
            "wq": u(ks[0], (D, D)), "bq": u(ks[1], (D,)),
            "wk": u(ks[2], (D, D)), "bk": u(ks[3], (D,)),
            "wv": u(ks[4], (D, D)), "bv": u(ks[5], (D,)),
            "wo": u(ks[6], (D, D)), "bo": u(ks[7], (D,)),
        }
        query = jax.random.normal(ks[8], (B, S, D), jnp.float32)
        if self_attn:
            key_x = query
            value = query
        else:
            key_x = jax.random.normal(ks[9], (B, S, D), jnp.float32)
            value = jax.random.normal(ks[10], (B, S, D), jnp.float32)

        out = multi_headed_attention(query, key_x, value, params, H,
                                     tq=tq, tk=tk)
        out = jax.block_until_ready(out)
        ref = _reference_mha(query, key_x, value, params, H)

        assert out.shape == (B, S, D)
        # bf16 MXU operands (f32 accumulation) -> looser tolerance than pure f32.
        err = float(jnp.max(jnp.abs(out - ref)))
        assert jnp.allclose(out, ref, atol=5e-2, rtol=5e-2), \
            f"mismatch vs reference (case {case_idx}), max abs err {err}"

    # Small shape consistent with the module (batch=2, seq=8, d_model=32, h=4),
    # distinct q/k/v (cross-attention / un-fused projection path).
    run_case(0, B=2, S=8, D=32, H=4)
    # Multi-tile case: exercises the online-softmax KV loop and query tiling.
    run_case(1, B=2, S=32, D=32, H=4, tq=16, tk=16)
    # Self-attention case with a 128-lane head group: fused QKV projection and
    # column-offset addressing of the fused (B, S, 3D) output.
    run_case(2, B=2, S=16, D=256, H=2, self_attn=True)

    print("KERNEL_OK")
</pallas_src>

<mosaic_0001>
module attributes {stable_mosaic.version = 11 : i64} {
  func.func @_linear_kernel(%arg0: i32, %arg1: i32, %arg2: i32, %arg3: memref<16x32xf32, #tpu.memory_space<vmem>>, %arg4: memref<32x32xbf16, #tpu.memory_space<vmem>>, %arg5: memref<1x32xf32, #tpu.memory_space<vmem>>, %arg6: memref<16x32xbf16, #tpu.memory_space<vmem>>, %arg7: memref<16x32xf32, #tpu.memory_space<vmem>>) attributes {dimension_semantics = [#tpu.dimension_semantics<parallel>, #tpu.dimension_semantics<parallel>, #tpu.dimension_semantics<arbitrary>], iteration_bounds = array<i64: 1, 1, 1>, scalar_prefetch = 0 : i64, scratch_operands = 1 : i64, tpu.core_type = #tpu.core_type<tc>, window_params = [{transform_indices = @transform_0, window_bounds = array<i64: 16, 32>}, {transform_indices = @transform_1, window_bounds = array<i64: 32, 32>}, {transform_indices = @transform_2, window_bounds = array<i64: 1, 32>}, {transform_indices = @transform_3, window_bounds = array<i64: 16, 32>}]} {
    %c0_i32 = arith.constant 0 : i32
    %0 = arith.cmpi eq, %arg2, %c0_i32 : i32
    %1 = arith.extui %0 : i1 to i32
    %c0_i32_0 = arith.constant 0 : i32
    %2 = arith.cmpi ne, %1, %c0_i32_0 : i32
    scf.if %2 {
      %cst_10 = arith.constant 0.000000e+00 : f32
      %13 = vector.broadcast %cst_10 : f32 to vector<16x32xf32>
      %c0_11 = arith.constant 0 : index
      %c0_12 = arith.constant 0 : index
      %14 = vector.load %arg7[%c0_11, %c0_12] : memref<16x32xf32, #tpu.memory_space<vmem>>, vector<16x32xf32>
      tpu.vector_store %arg7[%c0_11, %c0_12], %13 {strides = array<i32>} : memref<16x32xf32, #tpu.memory_space<vmem>>, vector<16x32xf32>,
    } else {
    }
    %c0 = arith.constant 0 : index
    %c0_1 = arith.constant 0 : index
    %3 = vector.load %arg3[%c0, %c0_1] : memref<16x32xf32, #tpu.memory_space<vmem>>, vector<16x32xf32>
    %4 = arith.truncf %3 : vector<16x32xf32> to vector<16x32xbf16>
    %c0_2 = arith.constant 0 : index
    %c0_3 = arith.constant 0 : index
    %5 = vector.load %arg7[%c0_2, %c0_3] : memref<16x32xf32, #tpu.memory_space<vmem>>, vector<16x32xf32>
    %c0_4 = arith.constant 0 : index
    %c0_5 = arith.constant 0 : index
    %6 = vector.load %arg4[%c0_4, %c0_5] : memref<32x32xbf16, #tpu.memory_space<vmem>>, vector<32x32xbf16>
    %cst = arith.constant dense<0.000000e+00> : vector<16x32xf32>
    %7 = tpu.matmul %4, %6, %cst {dimension_numbers = #tpu.dot_dimension_numbers<[1], [1], [0], [0], [0, 0, 1, 0], [], []>} : vector<16x32xbf16>, vector<32x32xbf16>, vector<16x32xf32> -> vector<16x32xf32>
    %8 = arith.addf %5, %7 : vector<16x32xf32>
    %c0_6 = arith.constant 0 : index
    %c0_7 = arith.constant 0 : index
    %9 = vector.load %arg7[%c0_6, %c0_7] : memref<16x32xf32, #tpu.memory_space<vmem>>, vector<16x32xf32>
    tpu.vector_store %arg7[%c0_6, %c0_7], %8 {strides = array<i32>} : memref<16x32xf32, #tpu.memory_space<vmem>>, vector<16x32xf32>,
    %c0_i32_8 = arith.constant 0 : i32
    %10 = arith.cmpi eq, %arg2, %c0_i32_8 : i32
    %11 = arith.extui %10 : i1 to i32
    %c0_i32_9 = arith.constant 0 : i32
    %12 = arith.cmpi ne, %11, %c0_i32_9 : i32
    scf.if %12 {
      %c0_10 = arith.constant 0 : index
      %c0_11 = arith.constant 0 : index
      %13 = vector.load %arg7[%c0_10, %c0_11] : memref<16x32xf32, #tpu.memory_space<vmem>>, vector<16x32xf32>
      %c0_12 = arith.constant 0 : index
      %c0_13 = arith.constant 0 : index
      %14 = vector.load %arg5[%c0_12, %c0_13] : memref<1x32xf32, #tpu.memory_space<vmem>>, vector<1x32xf32>
      %15 = vector.broadcast %14 : vector<1x32xf32> to vector<16x32xf32>
      %16 = arith.addf %13, %15 : vector<16x32xf32>
      %17 = arith.truncf %16 : vector<16x32xf32> to vector<16x32xbf16>
      %c0_14 = arith.constant 0 : index
      %c0_15 = arith.constant 0 : index
      %18 = vector.load %arg6[%c0_14, %c0_15] : memref<16x32xbf16, #tpu.memory_space<vmem>>, vector<16x32xbf16>
      tpu.vector_store %arg6[%c0_14, %c0_15], %17 {strides = array<i32>} : memref<16x32xbf16, #tpu.memory_space<vmem>>, vector<16x32xbf16>,
    } else {
    }
    return
  }
  func.func @transform_0(%arg0: i32, %arg1: i32, %arg2: i32) -> (i32, i32) {
    %c0_i32 = arith.constant 0 : i32
    return %arg0, %arg2 : i32, i32
  }
  func.func @transform_1(%arg0: i32, %arg1: i32, %arg2: i32) -> (i32, i32) {
    %c0_i32 = arith.constant 0 : i32
    return %arg1, %arg2 : i32, i32
  }
  func.func @transform_2(%arg0: i32, %arg1: i32, %arg2: i32) -> (i32, i32) {
    %c0_i32 = arith.constant 0 : i32
    %c0_i32_0 = arith.constant 0 : i32
    return %c0_i32, %arg1 : i32, i32
  }
  func.func @transform_3(%arg0: i32, %arg1: i32, %arg2: i32) -> (i32, i32) {
    %c0_i32 = arith.constant 0 : i32
    return %arg0, %arg1 : i32, i32
  }
}

</mosaic_0001>

<bundles_post_ra>
// kernel: tpu_custom_call.1
= control target key start
LH: loop header
LB: loop body
LE: loop exit
PB: predicated region body
PF: predicated region fallthrough
CT: control target
= control target key end

     0   :  { %8 = vsyncpa [#allocation4], 0  ;;  %s318_s0 = inlined_call_operand.hbm [shape: f32[16,32], index: 0, kind: input, shape index: {}]   ;;  %s319_s1 = inlined_call_operand.hbm [shape: bf16[32,32], index: 1, kind: input, shape index: {}]   ;;  %s320_s2 = inlined_call_operand.vmem [shape: f32[1,32], index: 2, kind: input, shape index: {}]   ;;  %s321_s3 = inlined_call_operand.hbm [shape: bf16[16,32], index: 3, kind: output, shape index: {}]  }
   0x1   :  { %9 = vsyncpa [#allocation7], 0 }
   0x2   :  { %10 = vsyncpa [#allocation5], 0  ;;  %s264_s12 = smov [#allocation3]  }
   0x3   :  { %s16_s13 = sshll.u32 %s264_s12, 4  ;;  %s17_s13 = int_to_ptr.vmem [resolvable:$true] %s16_s13 }
   0x4   :  { %s206_s14 = scalar_lea.vmem %s17_s13, 256  ;;  %p211_p1 = scmp.lt.s32.totalorder %s17_s13, %s17_s13 }
   0x5   :  { %p207_p0 = scmp.ne.s32.totalorder %s17_s13, %s206_s14  ;;  %p212_p2 = scmp.lt.s32.totalorder %s206_s14, %s206_s14 }
   0x7   :  { %p213_p3 = por %p212_p2, %p211_p1 }
   0x9   :  { %p214_p4 = pnand %p213_p3, %p207_p0 }
   0xb   :  { %217 = shalt.err (!%p214_p4)
}
   0xc   :  { %s265_s15 = smov 128   ;;  %s266_s16 = smov 8  }
   0xd   :  { %22 = dma.hbm_to_vmem [thread:$0]  %s318_s0, 256, %s17_s13, [#allocation4], %s265_s15, %s265_s15, %s266_s16  }
   0xe   :  { %s267_s19 = smov [#allocation6]  }
   0xf   :  { %s28_s20 = sshll.u32 %s267_s19, 4  ;;  %s29_s20 = int_to_ptr.vmem [resolvable:$true] %s28_s20 }
  0x10   :  { %s226_s21 = scalar_lea.vmem %s29_s20, 256  ;;  %p231_p6 = scmp.lt.s32.totalorder %s29_s20, %s29_s20 }
  0x11   :  { %p227_p5 = scmp.ne.s32.totalorder %s29_s20, %s226_s21  ;;  %p232_p7 = scmp.lt.s32.totalorder %s226_s21, %s226_s21 }
  0x13   :  { %p233_p8 = por %p232_p7, %p231_p6 }
  0x15   :  { %p234_p9 = pnand %p233_p8, %p227_p5 }
  0x17   :  { %237 = shalt.err (!%p234_p9)
}
  0x18   :  { %s268_s22 = smov 64   ;;  %s269_s23 = smov 4  }
  0x19   :  { %34 = dma.hbm_to_vmem [thread:$0]  %s319_s1, 256, %s29_s20, [#allocation7], %s268_s22, %s268_s22, %s269_s23  }
  0x1a   :  { %258 = dma.done.wait [#allocation4], 256  }
  0x1b   :  { %259 = vsyncadd [#allocation4], 4294967040 }
  0x1c   :  { %260 = dma.done.wait [#allocation7], 256  }
  0x1d   :  { %261 = vsyncadd [#allocation7], 4294967040  ;;  %vm48_vm0 = vcmask 261120   ;;  %v270_v0 = vmov 0.0   ;;  %vm271_vm1 = vmmov 0   ;;  %v196_v1 = vld [vmem:[#allocation6 + $0x8] sm:$0xff]  }
  0x1e   :  { %49 = vst.msk [vmem:[#allocation2] sm:$0xff] %vm48_vm0, %v270_v0  ;;  %50 = vst.msk [vmem:[#allocation2 + $0x8] sm:$0xff] %vm48_vm0, %v270_v0  ;;  %179 = vmatprep.subr.bf16.mxu0 %v270_v0  ;;  %183 = vmatprep.mubr.msk.bf16.mxu0 %vm271_vm1, %v270_v0  ;;  %v78_v2 = vsel %vm48_vm0, %v196_v1, 0  ;;  %v197_v3 = vld [vmem:[#allocation6] sm:$0xff]   ;;  %v51_v5 = vld [vmem:[#allocation3] sm:$0xff]  ;;  %vm147_vm2 = vcmask 257024  }
  0x1f   :  { %180 = vmatpush3.bf16.xpose.msra.mxu0 %v78_v2  ;;  %v75_v4 = vsel %vm48_vm0, %v197_v3, 0  ;;  %v52_v6 = vld [vmem:[#allocation3 + $0x8] sm:$0xff]  ;;  %v171_v16 = vld [vmem:[%s320_s2] ss:$0 sm:$0xff]  ;;  %s272_s26 = smov [#allocation8]  }
  0x20   :  { %181 = vmatprep.subr.bf16.mxu0 %v270_v0  ;;  %v53_v7 = vpack.c.bf16 %v52_v6, %v51_v5  ;;  %s155_s27 = sshll.u32 %s272_s26, 4  ;;  %s156_s27 = int_to_ptr.vmem [resolvable:$true] %s155_s27 }
  0x21   :  { %s238_s28 = scalar_lea.vmem %s156_s27, 128  ;;  %p243_p11 = scmp.lt.s32.totalorder %s156_s27, %s156_s27 }
  0x22   :  { %p239_p10 = scmp.ne.s32.totalorder %s156_s27, %s238_s28  ;;  %p244_p12 = scmp.lt.s32.totalorder %s238_s28, %s238_s28 }
  0x24   :  { %p245_p13 = por %p244_p12, %p243_p11 }
  0x25   :  { %v54_v8 = vld [vmem:[#allocation2] sm:$0xff]  ;;  %v55_v12 = vld [vmem:[#allocation2 + $0x8] sm:$0xff] }
  0x26   :  { %p246_p0 = pnand %p245_p13, %p239_p10 }
  0x27   :  { %182 = vmatpush3.bf16.xpose.msra.mxu0 %v75_v4 }
  0x2e   :  { %184 = vmatmul.mubr.msk.bf16.vlgmr.msra.gmra.mxu0 %vm48_vm0, %v53_v7 }
  0xee   :  { %v114_v9 = vpop.f32.mrf.mxu0 }
  0xef   :  { %v121_v10 = vadd.f32 %v114_v9, %v54_v8 }
  0xf0   :  { %v185_v11 = vpop.f32.mrf.mxu0 }
  0xf1   :  { %123 = vst.msk [vmem:[#allocation2] sm:$0xff] %vm48_vm0, %v121_v10 }
  0xf2   :  { %v117_v13 = vpop.f32.mrf.mxu0 }
  0xf3   :  { %v122_v14 = vadd.f32 %v117_v13, %v55_v12 }
  0xf4   :  { %v186_v15 = vpop.f32.mrf.mxu0 }
  0xf5   :  { %124 = vst.msk [vmem:[#allocation2 + $0x8] sm:$0xff] %vm48_vm0, %v122_v14 }
  0xf8   :  { %v128_v17 = vld [vmem:[#allocation2] sm:$0xff] }
  0xf9   :  { %v137_v18 = vadd.f32 %v171_v16, %v128_v17 }
  0xfb   :  { %v174_v19 = vpack.c.bf16 %v137_v18, %v137_v18 }
  0xfc   :  { %v129_v20 = vld [vmem:[#allocation2 + $0x8] sm:$0xff] }
  0xfd   :  { %v138_v21 = vadd.f32 %v171_v16, %v129_v20  ;;  %148 = vst.msk [vmem:[#allocation8] sm:$0xf] %vm147_vm2, %v174_v19 }
  0xff   :  { %v175_v22 = vpack.c.bf16 %v138_v21, %v138_v21 }
 0x101   :  { %149 = vst.msk [vmem:[#allocation8 + $0x4] sm:$0xf] %vm147_vm2, %v175_v22 }
 0x102   :  { %249 = shalt.err (!%p246_p0)
}
 0x103   :  { %161 = dma.vmem_to_hbm [thread:$0]  %s156_s27, 128, %s321_s3, [#allocation5], %s268_s22, %s268_s22, %s269_s23  }
 0x104   :  { %262 = dma.done.wait [#allocation5], 128  }
 0x105   :  { %263 = vsyncadd [#allocation5], 4294967168 }
 0x106   :  { %165 = vsyncpa [#allocation4], 1 }
 0x107   :  { %166 = vsyncpa [#allocation7], 1 }
 0x108   :  { %167 = vsyncpa [#allocation5], 1 }

</bundles_post_ra>
